<compile_context>
chip_gen: v6e
topology: v6e:2x2x1
jax: 0.10.0
libtpu: 0.0.40
codegen_flags: <defaults>
</compile_context>

<pallas_src>
import jax
import jax.numpy as jnp
from jax.experimental import pallas as pl
from jax.experimental.pallas import tpu as pltpu

# ----- problem sizes (num_tokens / num_tags are data-dependent in the original
#       script; hidden size 1000 is hard-coded in the module) -----
NUM_TOKENS = 32
NUM_TAGS = 16
HIDDEN = 1000
HIDDEN_PAD = 1024          # lane-aligned hidden size (zero padded, inert)
NT_PAD = 128               # lane-aligned tag axis (zero / -1e30 padded, inert)
MAX_TB = 128               # examples per grid step; 3*TB = 384 = 3x128 MXU M-tiles
                           # (256 also fine on v6e/v7x; 128 is safe on all chips)


def _round_up(x, m):
    return ((x + m - 1) // m) * m


def net_kernel(xin_ref,                  # (3, TB, NUM_TOKENS)  f32: [x | x_1 | x_2] blocks
               w1_ref, b1_ref,           # (NUM_TOKENS, 1024) bf16, (1, 1024) f32
               w3_ref, b3_ref,           # (1024, 128)        bf16, (1, 128) f32
               w2_ref, b2_ref,           # (3*128, 128) f32,  (1, 128) f32 (pad lanes -1e30)
               out_ref):                 # (TB, 128) f32 softmax probabilities (pad lanes 0)
    tb = out_ref.shape[0]
    ntp = out_ref.shape[1]               # 128

    # Merge the 3 branches of the TB examples into one MXU LHS.
    # (3, TB, T) -> (3*TB, T): TB % 8 == 0 and the lane dim is unchanged,
    # so this is a tile-contiguous view, not a relayout.
    x = xin_ref[...].reshape(3 * tb, xin_ref.shape[-1]).astype(jnp.bfloat16)

    # One fc1 and one fc3 matmul for all three branches of all TB examples.
    h = jnp.dot(x, w1_ref[...], preferred_element_type=jnp.float32) + b1_ref[...]
    h = jnp.maximum(h, 0.0)                                        # (3*TB, 1024) f32
    t = jnp.dot(h.astype(jnp.bfloat16), w3_ref[...],
                preferred_element_type=jnp.float32) + b3_ref[...]
    t = jnp.maximum(t, 0.0)                                        # (3*TB, 128) f32

    t0 = t[0:tb]              # branch(x)   for the TB examples
    t1 = t[tb:2 * tb]         # branch(x_1)
    t2 = t[2 * tb:3 * tb]     # branch(x_2)

    # fc2(concat(t0,t1,t2)) as three partial matmuls against static row slices
    # of the (padded) W2 -- no in-kernel lane concatenation.
    logits = (jnp.dot(t0, w2_ref[0:ntp, :], preferred_element_type=jnp.float32)
              + jnp.dot(t1, w2_ref[ntp:2 * ntp, :], preferred_element_type=jnp.float32)
              + jnp.dot(t2, w2_ref[2 * ntp:3 * ntp, :], preferred_element_type=jnp.float32)
              + b2_ref[...])                                       # pad lanes ~ -1e30

    # softmax along the tag axis (padded lanes contribute exp(-1e30 - m) == 0)
    m = jnp.max(logits, axis=-1, keepdims=True)
    e = jnp.exp(logits - m)
    denom = jnp.sum(e, axis=-1, keepdims=True)
    out_ref[...] = e * pl.reciprocal(denom, approx=True)


def net_forward_batched(xs, x1s, x2s, pp, *, max_tb=MAX_TB):
    """xs, x1s, x2s: (B, NUM_TOKENS). Returns (B, NUM_TAGS) softmax probs."""
    B0 = xs.shape[0]
    # Fill the MXU M-tile, but keep >= 2 grid steps when possible (v7x megacore).
    tb = max(8, min(max_tb, _round_up(pl.cdiv(B0, 2), 8)))
    Bp = _round_up(B0, tb)
    nblk = Bp // tb

    # (3, Bp, T) -- no wrapper-side transpose / re-layout; padding rows are inert.
    xin = jnp.stack([xs, x1s, x2s], axis=0).astype(jnp.float32)
    if Bp != B0:
        xin = jnp.pad(xin, ((0, 0), (0, Bp - B0), (0, 0)))

    weight_bytes = (pp["w1"].size * 2 + pp["b1"].size * 4
                    + pp["w3"].size * 2 + pp["b3"].size * 4
                    + pp["w2"].size * 4 + pp["b2"].size * 4)
    cost = pl.CostEstimate(
        flops=2 * 3 * Bp * (NUM_TOKENS * HIDDEN_PAD
                            + HIDDEN_PAD * NT_PAD
                            + NT_PAD * NT_PAD),
        transcendentals=Bp * NT_PAD,
        bytes_accessed=xin.size * 4 + weight_bytes + Bp * NT_PAD * 4)

    out = pl.pallas_call(
        net_kernel,
        out_shape=jax.ShapeDtypeStruct((Bp, NT_PAD), jnp.float32),
        grid_spec=pltpu.PrefetchScalarGridSpec(
            num_scalar_prefetch=0,
            grid=(nblk,),
            in_specs=[
                # input block for this grid step: all 3 branches of TB examples
                pl.BlockSpec((3, tb, NUM_TOKENS), lambda i: (0, i, 0)),
                # weights / biases: constant block index -> VMEM-resident across steps
                pl.BlockSpec((NUM_TOKENS, HIDDEN_PAD), lambda i: (0, 0)),
                pl.BlockSpec((1, HIDDEN_PAD), lambda i: (0, 0)),
                pl.BlockSpec((HIDDEN_PAD, NT_PAD), lambda i: (0, 0)),
                pl.BlockSpec((1, NT_PAD), lambda i: (0, 0)),
                pl.BlockSpec((3 * NT_PAD, NT_PAD), lambda i: (0, 0)),
                pl.BlockSpec((1, NT_PAD), lambda i: (0, 0)),
            ],
            out_specs=pl.BlockSpec((tb, NT_PAD), lambda i: (i, 0)),
        ),
        compiler_params=pltpu.CompilerParams(
            dimension_semantics=("parallel",),
            vmem_limit_bytes=64 << 20),
        cost_estimate=cost,
    )(xin, pp["w1"], pp["b1"], pp["w3"], pp["b3"], pp["w2"], pp["b2"])
    return out[:B0, :NUM_TAGS]


def net_forward(x, x_1, x_2, pp):
    """Single-example forward, matching Net.forward(x, x_1, x_2) semantics."""
    return net_forward_batched(x[None, :], x_1[None, :], x_2[None, :], pp)[0]


def init_params(key):
    """Deterministic synthetic parameters (shapes from Net.__init__).
    Weights stored as (in_features, out_features)."""
    ks = jax.random.split(key, 6)

    def unif(k, shape, fan_in):
        bound = 1.0 / jnp.sqrt(jnp.float32(fan_in))
        return jax.random.uniform(k, shape, jnp.float32, -bound, bound)

    return {
        "w1": unif(ks[0], (NUM_TOKENS, HIDDEN), NUM_TOKENS),
        "b1": unif(ks[1], (HIDDEN,), NUM_TOKENS),
        "w2": unif(ks[2], (3 * NUM_TAGS, NUM_TAGS), 3 * NUM_TAGS),
        "b2": unif(ks[3], (NUM_TAGS,), 3 * NUM_TAGS),
        "w3": unif(ks[4], (HIDDEN, NUM_TAGS), HIDDEN),
        "b3": unif(ks[5], (NUM_TAGS,), HIDDEN),
    }


def prepare_params(params):
    """Pad HIDDEN 1000->1024 and the tag axis 16->128 (inert: zeros except b2's
    padded lanes = -1e30 so the softmax ignores them); cast big weights to bf16."""
    w1 = jnp.zeros((NUM_TOKENS, HIDDEN_PAD), jnp.float32).at[:, :HIDDEN].set(params["w1"])
    b1 = jnp.zeros((1, HIDDEN_PAD), jnp.float32).at[0, :HIDDEN].set(params["b1"])
    w3 = jnp.zeros((HIDDEN_PAD, NT_PAD), jnp.float32).at[:HIDDEN, :NUM_TAGS].set(params["w3"])
    b3 = jnp.zeros((1, NT_PAD), jnp.float32).at[0, :NUM_TAGS].set(params["b3"])
    w2 = jnp.zeros((3 * NT_PAD, NT_PAD), jnp.float32)
    for s in range(3):
        w2 = w2.at[s * NT_PAD:s * NT_PAD + NUM_TAGS, :NUM_TAGS].set(
            params["w2"][s * NUM_TAGS:(s + 1) * NUM_TAGS])
    b2 = jnp.full((1, NT_PAD), -1e30, jnp.float32).at[0, :NUM_TAGS].set(params["b2"])
    return {
        "w1": w1.astype(jnp.bfloat16),
        "b1": b1,
        "w3": w3.astype(jnp.bfloat16),
        "b3": b3,
        "w2": w2,
        "b2": b2,
    }


def net_reference_batched(xs, x1s, x2s, params):
    """Pure-JAX reference on the unpadded params with matching bf16 casts."""
    w1 = params["w1"].astype(jnp.bfloat16).astype(jnp.float32)
    w3 = params["w3"].astype(jnp.bfloat16).astype(jnp.float32)

    def branch(v):
        vb = v.astype(jnp.bfloat16).astype(jnp.float32)
        h = jnp.maximum(vb @ w1 + params["b1"], 0.0)
        hb = h.astype(jnp.bfloat16).astype(jnp.float32)
        return jnp.maximum(hb @ w3 + params["b3"], 0.0)

    x_com = jnp.concatenate([branch(xs), branch(x1s), branch(x2s)], axis=-1)
    logits = x_com @ params["w2"] + params["b2"]
    return jax.nn.softmax(logits, axis=-1)


if __name__ == "__main__":
    key = jax.random.PRNGKey(0)
    kp, kx = jax.random.split(key, 2)
    params = init_params(kp)
    pp = prepare_params(params)

    # Small deterministic batch of bag-of-token count vectors.
    B = 16
    counts = jax.random.randint(kx, (3, B, NUM_TOKENS), 0, 4).astype(jnp.float32)
    xs, x1s, x2s = counts[0], counts[1], counts[2]

    out = jax.block_until_ready(net_forward_batched(xs, x1s, x2s, pp))
    ref = net_reference_batched(xs, x1s, x2s, params)

    assert out.shape == (B, NUM_TAGS)
    assert bool(jnp.all(jnp.abs(jnp.sum(out, axis=-1) - 1.0) < 1e-2))
    assert bool(jnp.allclose(out, ref, atol=2e-2, rtol=2e-2))

    # Single-example path (matches the Net.forward(x, x_1, x_2) signature).
    single = jax.block_until_ready(net_forward(xs[0], x1s[0], x2s[0], pp))
    assert single.shape == (NUM_TAGS,)
    assert bool(jnp.allclose(single, out[0], atol=2e-2, rtol=2e-2))

    print("KERNEL_OK")
</pallas_src>

<mosaic_0001>
module attributes {stable_mosaic.version = 11 : i64} {
  func.func @net_kernel(%arg0: i32, %arg1: memref<3x8x32xf32, #tpu.memory_space<vmem>>, %arg2: memref<32x1024xbf16, #tpu.memory_space<vmem>>, %arg3: memref<1x1024xf32, #tpu.memory_space<vmem>>, %arg4: memref<1024x128xbf16, #tpu.memory_space<vmem>>, %arg5: memref<1x128xf32, #tpu.memory_space<vmem>>, %arg6: memref<384x128xf32, #tpu.memory_space<vmem>>, %arg7: memref<1x128xf32, #tpu.memory_space<vmem>>, %arg8: memref<8x128xf32, #tpu.memory_space<vmem>>) attributes {dimension_semantics = [#tpu.dimension_semantics<parallel>], iteration_bounds = array<i64: 2>, scalar_prefetch = 0 : i64, scratch_operands = 0 : i64, tpu.core_type = #tpu.core_type<tc>, window_params = [{transform_indices = @transform_0, window_bounds = array<i64: 3, 8, 32>}, {pipeline_mode = #tpu.pipeline_mode<synchronous>, transform_indices = @transform_1, window_bounds = array<i64: 32, 1024>}, {pipeline_mode = #tpu.pipeline_mode<synchronous>, transform_indices = @transform_2, window_bounds = array<i64: 1, 1024>}, {pipeline_mode = #tpu.pipeline_mode<synchronous>, transform_indices = @transform_3, window_bounds = array<i64: 1024, 128>}, {pipeline_mode = #tpu.pipeline_mode<synchronous>, transform_indices = @transform_4, window_bounds = array<i64: 1, 128>}, {pipeline_mode = #tpu.pipeline_mode<synchronous>, transform_indices = @transform_5, window_bounds = array<i64: 384, 128>}, {pipeline_mode = #tpu.pipeline_mode<synchronous>, transform_indices = @transform_6, window_bounds = array<i64: 1, 128>}, {transform_indices = @transform_7, window_bounds = array<i64: 8, 128>}]} {
    %c0 = arith.constant 0 : index
    %c0_0 = arith.constant 0 : index
    %c0_1 = arith.constant 0 : index
    %0 = vector.load %arg1[%c0, %c0_0, %c0_1] : memref<3x8x32xf32, #tpu.memory_space<vmem>>, vector<3x8x32xf32>
    %1 = vector.shape_cast %0 : vector<3x8x32xf32> to vector<24x32xf32>
    %2 = arith.truncf %1 : vector<24x32xf32> to vector<24x32xbf16>
    %c0_2 = arith.constant 0 : index
    %c0_3 = arith.constant 0 : index
    %3 = vector.load %arg2[%c0_2, %c0_3] : memref<32x1024xbf16, #tpu.memory_space<vmem>>, vector<32x1024xbf16>
    %cst = arith.constant dense<0.000000e+00> : vector<24x1024xf32>
    %4 = tpu.matmul %2, %3, %cst {dimension_numbers = #tpu.dot_dimension_numbers<[1], [0], [0], [1], [0, 0, 1, 1], [], []>} : vector<24x32xbf16>, vector<32x1024xbf16>, vector<24x1024xf32> -> vector<24x1024xf32>
    %c0_4 = arith.constant 0 : index
    %c0_5 = arith.constant 0 : index
    %5 = vector.load %arg3[%c0_4, %c0_5] : memref<1x1024xf32, #tpu.memory_space<vmem>>, vector<1x1024xf32>
    %6 = vector.broadcast %5 : vector<1x1024xf32> to vector<24x1024xf32>
    %7 = arith.addf %4, %6 : vector<24x1024xf32>
    %cst_6 = arith.constant 0.000000e+00 : f32
    %8 = vector.broadcast %cst_6 : f32 to vector<24x1024xf32>
    %9 = arith.maximumf %7, %8 : vector<24x1024xf32>
    %10 = arith.truncf %9 : vector<24x1024xf32> to vector<24x1024xbf16>
    %c0_7 = arith.constant 0 : index
    %c0_8 = arith.constant 0 : index
    %11 = vector.load %arg4[%c0_7, %c0_8] : memref<1024x128xbf16, #tpu.memory_space<vmem>>, vector<1024x128xbf16>
    %cst_9 = arith.constant dense<0.000000e+00> : vector<24x128xf32>
    %12 = tpu.matmul %10, %11, %cst_9 {dimension_numbers = #tpu.dot_dimension_numbers<[1], [0], [0], [1], [0, 0, 1, 1], [], []>} : vector<24x1024xbf16>, vector<1024x128xbf16>, vector<24x128xf32> -> vector<24x128xf32>
    %c0_10 = arith.constant 0 : index
    %c0_11 = arith.constant 0 : index
    %13 = vector.load %arg5[%c0_10, %c0_11] : memref<1x128xf32, #tpu.memory_space<vmem>>, vector<1x128xf32>
    %14 = vector.broadcast %13 : vector<1x128xf32> to vector<24x128xf32>
    %15 = arith.addf %12, %14 : vector<24x128xf32>
    %cst_12 = arith.constant 0.000000e+00 : f32
    %16 = vector.broadcast %cst_12 : f32 to vector<24x128xf32>
    %17 = arith.maximumf %15, %16 : vector<24x128xf32>
    %18 = vector.extract_strided_slice %17 {offsets = [0, 0], sizes = [8, 128], strides = [1, 1]} : vector<24x128xf32> to vector<8x128xf32>
    %19 = vector.extract_strided_slice %17 {offsets = [8, 0], sizes = [8, 128], strides = [1, 1]} : vector<24x128xf32> to vector<8x128xf32>
    %20 = vector.extract_strided_slice %17 {offsets = [16, 0], sizes = [8, 128], strides = [1, 1]} : vector<24x128xf32> to vector<8x128xf32>
    %c0_13 = arith.constant 0 : index
    %c0_14 = arith.constant 0 : index
    %21 = vector.load %arg6[%c0_13, %c0_14] : memref<384x128xf32, #tpu.memory_space<vmem>>, vector<128x128xf32>
    %cst_15 = arith.constant dense<0.000000e+00> : vector<8x128xf32>
    %22 = tpu.matmul %18, %21, %cst_15 {dimension_numbers = #tpu.dot_dimension_numbers<[1], [0], [0], [1], [0, 0, 1, 1], [], []>} : vector<8x128xf32>, vector<128x128xf32>, vector<8x128xf32> -> vector<8x128xf32>
    %c128 = arith.constant 128 : index
    %c0_16 = arith.constant 0 : index
    %23 = vector.load %arg6[%c128, %c0_16] : memref<384x128xf32, #tpu.memory_space<vmem>>, vector<128x128xf32>
    %cst_17 = arith.constant dense<0.000000e+00> : vector<8x128xf32>
    %24 = tpu.matmul %19, %23, %cst_17 {dimension_numbers = #tpu.dot_dimension_numbers<[1], [0], [0], [1], [0, 0, 1, 1], [], []>} : vector<8x128xf32>, vector<128x128xf32>, vector<8x128xf32> -> vector<8x128xf32>
    %25 = arith.addf %22, %24 : vector<8x128xf32>
    %c256 = arith.constant 256 : index
    %c0_18 = arith.constant 0 : index
    %26 = vector.load %arg6[%c256, %c0_18] : memref<384x128xf32, #tpu.memory_space<vmem>>, vector<128x128xf32>
    %cst_19 = arith.constant dense<0.000000e+00> : vector<8x128xf32>
    %27 = tpu.matmul %20, %26, %cst_19 {dimension_numbers = #tpu.dot_dimension_numbers<[1], [0], [0], [1], [0, 0, 1, 1], [], []>} : vector<8x128xf32>, vector<128x128xf32>, vector<8x128xf32> -> vector<8x128xf32>
    %28 = arith.addf %25, %27 : vector<8x128xf32>
    %c0_20 = arith.constant 0 : index
    %c0_21 = arith.constant 0 : index
    %29 = vector.load %arg7[%c0_20, %c0_21] : memref<1x128xf32, #tpu.memory_space<vmem>>, vector<1x128xf32>
    %30 = vector.broadcast %29 : vector<1x128xf32> to vector<8x128xf32>
    %31 = arith.addf %28, %30 : vector<8x128xf32>
    %cst_22 = arith.constant dense<0xFF800000> : vector<8xf32>
    %32 = vector.multi_reduction <maximumf>, %31, %cst_22 [1] : vector<8x128xf32> to vector<8xf32>
    %33 = vector.shape_cast %32 : vector<8xf32> to vector<8x1xf32>
    %34 = vector.broadcast %33 : vector<8x1xf32> to vector<8x128xf32>
    %35 = arith.subf %31, %34 : vector<8x128xf32>
    %36 = math.exp %35 : vector<8x128xf32>
    %cst_23 = arith.constant dense<0.000000e+00> : vector<8xf32>
    %37 = vector.multi_reduction <add>, %36, %cst_23 [1] : vector<8x128xf32> to vector<8xf32>
    %38 = vector.shape_cast %37 : vector<8xf32> to vector<8x1xf32>
    %39 = tpu.reciprocal %38 {approx = true} : vector<8x1xf32> -> vector<8x1xf32>
    %40 = vector.broadcast %39 : vector<8x1xf32> to vector<8x128xf32>
    %41 = arith.mulf %36, %40 : vector<8x128xf32>
    %c0_24 = arith.constant 0 : index
    %c0_25 = arith.constant 0 : index
    %42 = vector.load %arg8[%c0_24, %c0_25] : memref<8x128xf32, #tpu.memory_space<vmem>>, vector<8x128xf32>
    tpu.vector_store %arg8[%c0_24, %c0_25], %41 {strides = array<i32>} : memref<8x128xf32, #tpu.memory_space<vmem>>, vector<8x128xf32>,
    return
  }
  func.func @transform_0(%arg0: i32) -> (i32, i32, i32) {
    %c0_i32 = arith.constant 0 : i32
    %c0_i32_0 = arith.constant 0 : i32
    %c0_i32_1 = arith.constant 0 : i32
    return %c0_i32, %arg0, %c0_i32_0 : i32, i32, i32
  }
  func.func @transform_1(%arg0: i32) -> (i32, i32) {
    %c0_i32 = arith.constant 0 : i32
    %c0_i32_0 = arith.constant 0 : i32
    %c0_i32_1 = arith.constant 0 : i32
    return %c0_i32, %c0_i32_0 : i32, i32
  }
  func.func @transform_2(%arg0: i32) -> (i32, i32) {
    %c0_i32 = arith.constant 0 : i32
    %c0_i32_0 = arith.constant 0 : i32
    %c0_i32_1 = arith.constant 0 : i32
    return %c0_i32, %c0_i32_0 : i32, i32
  }
  func.func @transform_3(%arg0: i32) -> (i32, i32) {
    %c0_i32 = arith.constant 0 : i32
    %c0_i32_0 = arith.constant 0 : i32
    %c0_i32_1 = arith.constant 0 : i32
    return %c0_i32, %c0_i32_0 : i32, i32
  }
  func.func @transform_4(%arg0: i32) -> (i32, i32) {
    %c0_i32 = arith.constant 0 : i32
    %c0_i32_0 = arith.constant 0 : i32
    %c0_i32_1 = arith.constant 0 : i32
    return %c0_i32, %c0_i32_0 : i32, i32
  }
  func.func @transform_5(%arg0: i32) -> (i32, i32) {
    %c0_i32 = arith.constant 0 : i32
    %c0_i32_0 = arith.constant 0 : i32
    %c0_i32_1 = arith.constant 0 : i32
    return %c0_i32, %c0_i32_0 : i32, i32
  }
  func.func @transform_6(%arg0: i32) -> (i32, i32) {
    %c0_i32 = arith.constant 0 : i32
    %c0_i32_0 = arith.constant 0 : i32
    %c0_i32_1 = arith.constant 0 : i32
    return %c0_i32, %c0_i32_0 : i32, i32
  }
  func.func @transform_7(%arg0: i32) -> (i32, i32) {
    %c0_i32 = arith.constant 0 : i32
    %c0_i32_0 = arith.constant 0 : i32
    return %arg0, %c0_i32 : i32, i32
  }
}

</mosaic_0001>

<bundles_post_ra>
// kernel: tpu_custom_call.1
= control target key start
LH: loop header
LB: loop body
LE: loop exit
PB: predicated region body
PF: predicated region fallthrough
CT: control target
= control target key end

     0   :  { %s3009_s0 = inlined_call_operand.hbm [shape: f32[3,16,32], index: 0, kind: input, shape index: {}]   ;;  %s3010_s1 = inlined_call_operand.hbm [shape: bf16[32,1024], index: 1, kind: input, shape index: {}]   ;;  %s3011_s2 = inlined_call_operand.hbm [shape: f32[1,1024], index: 2, kind: input, shape index: {}]   ;;  %s3012_s3 = inlined_call_operand.hbm [shape: bf16[1024,128], index: 3, kind: input, shape index: {}]   ;;  %s3013_s4 = inlined_call_operand.vmem [shape: f32[1,128], index: 4, kind: input, shape index: {}]   ;;  %s3014_s5 = inlined_call_operand.hbm [shape: f32[384,128], index: 5, kind: input, shape index: {}]   ;;  %s3015_s6 = inlined_call_operand.vmem [shape: f32[1,128], index: 6, kind: input, shape index: {}]   ;;  %s3016_s7 = inlined_call_operand.hbm [shape: f32[16,128], index: 7, kind: output, shape index: {}]  }
   0x1   :  { %3023 = sst [smem:[#allocation16_spill]] %s3010_s1 }
   0x2   :  { %12 = vsyncpa [#allocation3], 0 }
   0x3   :  { %14 = vsyncpa [#allocation3 + $0x1], 0 }
   0x4   :  { %15 = vsyncpa [#allocation6], 0 }
   0x5   :  { %16 = vsyncpa [#allocation9], 0 }
   0x6   :  { %17 = vsyncpa [#allocation4], 0 }
   0x7   :  { %19 = vsyncpa [#allocation4 + $0x1], 0  ;;  %s2665_s24 = smov 0   ;;  %s2667_s25 = smov 0  }
   0x8   :  { %s2669_s26 = smov 0   ;;  %s2671_s27 = smov 0  }
   0x9 LB: > { %s2686_s28 = sadd.s32 4294967295, %s2607_s27   ;;  %s1860_s29 = sadd.s32 4294967294, %s2607_s27   ;;  %s2607_s27 = sphi %s2671_s27, %s3046_s27   ;;  %s2603_s26 = sphi %s2669_s26, %s3045_s26   ;;  %s2599_s25 = sphi %s2667_s25, %s3044_s25   ;;  %s2595_s24 = sphi %s2665_s24, %s3043_s24  }
   0xa   : > { %p45_p0 = scmp.ne.s32.totalorder %s2599_s25, %s2595_s24  ;;  %p3017_p1 = scmp.eq.s32.totalorder %s2686_s28, 0 }
   0xb   : > { %p201_p3 = scmp.eq.s32.totalorder %s1860_s29, 1  ;;  %p1861_p5 = scmp.ge.s32.totalorder %s2607_s27, 1 }
   0xc   : > { %p2695_p4 = por %p3017_p1, %p45_p0  ;;  %p208_p7 = scmp.lt.s32.totalorder %s2607_s27, 3 }
   0xd   : > { %p2700_p6 = por %p201_p3, %p45_p0  ;;  %s2609_s10 = smov [#allocation5]  }
   0xe   : > { %s3024_s30 = scalar_select %p2695_p4, 1, 0 }
   0xf   : > { %s3025_s8 = scalar_select %p2700_p6, 1, 0 }
  0x10   : > { %p2705_p8 = pnand %p1861_p5, %p208_p7  ;;  %s220_s11 = sshll.u32 %s2609_s10, 4  ;;  %s221_s11 = int_to_ptr.vmem [resolvable:$true] %s220_s11 }
  0x11   : > { %s2610_s13 = smov [#allocation8]   ;;  %s2414_s15 = scalar_lea.vmem %s221_s11, 2048 }
  0x12   : > { %s3026_s9 = scalar_select %p2705_p8, 1, 0 }
  0x13   : > { %p2258_p9 = pneg %p2705_p8  ;;  %s244_s14 = sshll.u32 %s2610_s13, 4  ;;  %s245_s14 = int_to_ptr.vmem [resolvable:$true] %s244_s14 }
  0x14   : > { %p2415_p13 = scmp.ne.s32.totalorder %s221_s11, %s2414_s15  ;;  %p2422_p5 = scmp.lt.s32.totalorder %s221_s11, %s221_s11 }
  0x15   : > { %p2714_p11 = pnand %p2258_p9, %p3017_p1  ;;  %p2423_p7 = scmp.lt.s32.totalorder %s2414_s15, %s2414_s15 }
  0x17   : > { %p2405_p12 = pneg %p2714_p11  ;;  %p2424_p10 = por %p2423_p7, %p2422_p5 }
  0x19   : > { %p2417_p0 = pnand %p2415_p13, %p2405_p12 }
  0x1b   : > { %p2418_p3 = pneg %p2417_p0 }
  0x1d   : > { %p2425_p9 = pnand %p2424_p10, %p2418_p3 }
  0x1f   : > { %2428 = shalt.err (!%p2425_p9)
}
  0x20   : > { %s2611_s16 = smov 512   ;;  %s2612_s17 = smov 32  }
  0x21   : > { %s3028_s1 = sld [smem:[#allocation16_spill]]  ;;  %s2440_s20 = scalar_lea.vmem %s245_s14, 8192 }
  0x22   : > { %p2441_p1 = scmp.ne.s32.totalorder %s245_s14, %s2440_s20  ;;  %p2448_p2 = scmp.lt.s32.totalorder %s245_s14, %s245_s14 }
  0x23   : > { %p2449_p6 = scmp.lt.s32.totalorder %s2440_s20, %s2440_s20 }
  0x24   : > { %p2443_p13 = pnand %p2441_p1, %p2405_p12 }
  0x25   : > { %p2450_p5 = por %p2449_p6, %p2448_p2 }
  0x26   : > { %p2444_p0 = pneg %p2443_p13 }
  0x27   : > { %2261 = dma.hbm_to_vmem [thread:$0]  (!%p2714_p11), %s3028_s1, 2048, %s221_s11, [#allocation6], %s2611_s16, %s2611_s16, %s2612_s17  }
  0x28   : > { %p2451_p10 = pnand %p2450_p5, %p2444_p0 }
  0x2a   : > { %2454 = shalt.err (!%p2451_p10)
}
  0x2b   : > { %s2613_s21 = smov 64   ;;  %s2614_s22 = smov 4  }
  0x2c   : > { %2267 = dma.hbm_to_vmem [thread:$0]  (!%p2714_p11), %s3012_s3, 8192, %s245_s14, [#allocation9], %s2613_s21, %s2613_s21, %s2614_s22  }
  0x2d   : > { %s2615_s10 = smov [#allocation7]   ;;  %s2616_s13 = smov [#allocation10]  }
  0x2e   : > { %s234_s11 = sshll.u32 %s2615_s10, 4  ;;  %s260_s15 = sshll.u32 %s2616_s13, 4  ;;  %s235_s11 = int_to_ptr.vmem [resolvable:$true] %s234_s11  ;;  %s261_s15 = int_to_ptr.vmem [resolvable:$true] %s260_s15 }
  0x2f   : > { %s2466_s16 = scalar_lea.vmem %s235_s11, 128  ;;  %p2474_p3 = scmp.lt.s32.totalorder %s235_s11, %s235_s11 }
  0x30   : > { %p2467_p1 = scmp.ne.s32.totalorder %s235_s11, %s2466_s16  ;;  %p2475_p7 = scmp.lt.s32.totalorder %s2466_s16, %s2466_s16 }
  0x32   : > { %p2469_p2 = pnand %p2467_p1, %p2405_p12  ;;  %p2476_p9 = por %p2475_p7, %p2474_p3 }
  0x34   : > { %p2470_p6 = pneg %p2469_p2 }
  0x36   : > { %p2477_p13 = pnand %p2476_p9, %p2470_p6 }
  0x38   : > { %2480 = shalt.err (!%p2477_p13)
}
  0x39   : > { %2264 = dma.hbm_to_vmem [thread:$0]  (!%p2714_p11), %s3011_s2, 128, %s235_s11, [#allocation6]  }
  0x3a   : > { %s2492_s18 = scalar_lea.vmem %s261_s15, 6144  ;;  %p2500_p1 = scmp.lt.s32.totalorder %s261_s15, %s261_s15 }
  0x3b   : > { %p2493_p0 = scmp.ne.s32.totalorder %s261_s15, %s2492_s18  ;;  %p2501_p2 = scmp.lt.s32.totalorder %s2492_s18, %s2492_s18 }
  0x3d   : > { %p2495_p5 = pnand %p2493_p0, %p2405_p12  ;;  %p2502_p4 = por %p2501_p2, %p2500_p1 }
  0x3f   : > { %p2496_p10 = pneg %p2495_p5 }
  0x41   : > { %p2503_p8 = pnand %p2502_p4, %p2496_p10 }
  0x43   : > { %2506 = shalt.err (!%p2503_p8)
}
  0x44   : > { %s3020_s19 = smov 128   ;;  %s3021_s20 = smov 8  }
  0x45   : > { %2270 = dma.hbm_to_vmem [thread:$0]  (!%p2714_p11), %s3014_s5, 6144, %s261_s15, [#allocation9], %s3020_s19, %s3020_s19, %s3021_s20  }
  0x46   : > { %s2756_s23 = sadd.s32 1, %s2607_s27   ;;  %s32_s10 = sadd.s32 1, %s2603_s26 }
  0x47   : > { %s29_s29 = ssub.s32 %s2607_s27, %s2756_s23  ;;  %p39_p8 = scmp.ne.s32.totalorder %s2603_s26, %s2599_s25 }
  0x48   : > { %p30_p4 = scmp.eq.s32.totalorder %s29_s29, 0  ;;  %p40_p12 = scmp.eq.s32.totalorder %s2607_s27, 0 }
  0x49   : > { %p3029_p3 = scmp.eq.s32.totalorder %s2686_s28, 1  ;;  %p2283_p9 = scmp.lt.s32.totalorder %s2607_s27, 2 }
  0x4a   : > { %s2765_s11 = scalar_select %p30_p4, %s2603_s26, %s32_s10  }
  0x4b   : > { %p41_p6 = por %p40_p12, %p39_p8  ;;  %p2769_p7 = por %p3029_p3, %p39_p8 }
  0x4c   : > { %s277_s13 = sand.u32 1, %s2603_s26   ;;  %s1867_s15 = sshll.u32 %s2607_s27, 7 }
  0x4d   : > { %s3030_s12 = scalar_select %p2769_p7, 1, 0 }
  0x4e   : > { %s2236_s16 = smul.u32 24, %s277_s13  ;;  %p2776_p11 = pnand %p2283_p9, %p41_p6 }
  0x4f   : > { %s2783_s21 = scalar_lea.hbm %s3009_s0, %s1867_s15  ;;  %s2787_s10 = scalar_lea.sflag [#allocation3], %s277_s13 }
  0x50   : > { %s281_s22 = scalar_lea.vmem [#allocation2], %s2236_s16  ;;  %s2507_s19 = scalar_lea.hbm %s2783_s21, 384 }
  0x51   : > { %s287_s29 = sshll.u32 %s281_s22, 4  ;;  %p2508_p13 = scmp.ne.s32.totalorder %s2783_s21, %s2507_s19  ;;  %s2785_s29 = int_to_ptr.vmem [resolvable:$true] %s287_s29 }
  0x52   : > { %p2509_p0 = pneg %p2776_p11  ;;  %s2512_s15 = scalar_lea.hbm %s3009_s0, 768 }
  0x53   : > { %p2513_p1 = scmp.lt.s32.totalorder %s2783_s21, %s3009_s0  ;;  %p2514_p2 = scmp.lt.s32.totalorder %s2512_s15, %s2507_s19 }
  0x54   : > { %p2510_p5 = pnand %p2509_p0, %p2508_p13 }
  0x55   : > { %p2515_p4 = por %p2514_p2, %p2513_p1 }
  0x56   : > { %p2511_p10 = pneg %p2510_p5 }
  0x58   : > { %p2516_p8 = pnand %p2515_p4, %p2511_p10 }
  0x5a   : > { %2519 = shalt.err (!%p2516_p8)
}
  0x5b   : > { %s2520_s13 = scalar_lea.vmem %s2785_s29, 384  ;;  %s2619_s16 = smov [#allocation2]  }
  0x5c   : > { %p2521_p12 = scmp.ne.s32.totalorder %s2785_s29, %s2520_s13  ;;  %s2525_s22 = sshll.u32 %s2619_s16, 4  ;;  %s2526_s22 = int_to_ptr.vmem [resolvable:$false] %s2525_s22 }
  0x5d   : > { %s2527_s20 = scalar_lea.vmem %s2526_s22, 768  ;;  %p2528_p9 = scmp.lt.s32.totalorder %s2785_s29, %s2526_s22 }
  0x5e   : > { %p2523_p6 = pnand %p2521_p12, %p2509_p0  ;;  %p2529_p13 = scmp.lt.s32.totalorder %s2527_s20, %s2520_s13 }
  0x60   : > { %p2524_p3 = pneg %p2523_p6  ;;  %p2530_p5 = por %p2529_p13, %p2528_p9 }
  0x62   : > { %p2531_p7 = pnand %p2530_p5, %p2524_p3 }
  0x64   : > { %2534 = shalt.err (!%p2531_p7)
}
  0x65   : > { %s2620_s1 = smov 256   ;;  %s3032_s19 = smov 8  }
  0x66   : > { %s3033_s17 = smov 128   ;;  %p3034_p0 = scmp.ne.s32.totalorder %s3026_s9, 0 }
  0x67   : > { %2274 = dma.hbm_to_vmem [thread:$0]  (!%p2776_p11), %s2783_s21, 384, %s2785_s29, %s2787_s10, %s2620_s1, %s3033_s17, %s3032_s19  }
  0x68   : > { %299 = sbr.rel (%p3034_p0) target bundleno = 1140 (0x474), region = 48  ;;  %s2813_s15 = sand.u32 (!%p3034_p0), 1, %s2599_s25  }
  0x69   : > { %s2237_s18 = smul.u32 (!%p3034_p0), 24, %s2813_s15  ;;  %s302_s13 = scalar_lea.sflag (!%p3034_p0), [#allocation3], %s2813_s15 }
  0x6a   : > { %p3035_p7 = scmp.ne.s32.totalorder (!%p3034_p0), %s3024_s30, 0 }
  0x6b   : > { %s2817_s16 = scalar_lea.vmem (!%p3034_p0), [#allocation2], %s2237_s18 }
  0x6d   : > { %2578 = dma.done.wait (%p3035_p7), %s302_s13, 384  }
  0x6e   : > { %2580 = vsyncadd (%p3035_p7), %s302_s13, 4294966912  ;;  %p3036_p11 = scmp.eq.s32.totalorder %s2686_s28, 0 }
  0x70   : > { %2582 = dma.done.wait (%p3036_p11), [#allocation6], 2176   ;;  %p3037_p10 = pmov %p3036_p11 }
  0x72   : > { %2584 = vsyncadd (%p3037_p10), [#allocation6], 4294965120  ;;  %p3038_p1 = pmov %p3037_p10 }
  0x74   : > { %2586 = dma.done.wait (%p3038_p1), [#allocation9], 14336   ;;  %p3039_p2 = pmov %p3038_p1 }
  0x75   : > { %v2621_v0 = vmov 0   ;;  %v366_v1 = vld [vmem:[#allocation5 + $0x40] sm:$0xff]  ;;  %v367_v8 = vld [vmem:[#allocation5 + $0x48] sm:$0xff]  ;;  %v354_v11 = vld [vmem:[%s2817_s16 + $0x8] sm:$0xff]  ;;  %vm496_vm0 = vcmask 261120   ;;  %vm2623_vm1 = vmmov 0  }
  0x76   : > { %2588 = vsyncadd (%p3039_p2), [#allocation9], 4294952960  ;;  %535 = vmatprep.mubr.bf16.mxu1 %v2621_v0  ;;  %637 = vmatprep.mubr.bf16.mxu0 %v2621_v0  ;;  %v370_v2 = vld [vmem:[#allocation5 + $0x60] sm:$0xff]  ;;  %v371_v9 = vld [vmem:[#allocation5 + $0x68] sm:$0xff]  ;;  %s1873_s29 = sshll.u32 %s2813_s15, 3  ;;  %s1965_s10 = sshll.u32 %s2686_s28, 7 }
  0x77   : > { %v358_v3 = vld [vmem:[#allocation5] sm:$0xff]  ;;  %v1883_v4 = vcombine.high %v366_v1, %v370_v2  ;;  %v1882_v5 = vcombine.low %v366_v1, %v370_v2  ;;  %v353_v10 = vld [vmem:[%s2817_s16] sm:$0xff]  ;;  %v1885_v17 = vcombine.high %v367_v8, %v371_v9  ;;  %v1884_v24 = vcombine.low %v367_v8, %v371_v9  ;;  %v369_v25 = vld [vmem:[#allocation5 + $0x58] sm:$0xff]  ;;  %s351_s22 = scalar_lea.vmem [#allocation11], %s1873_s29  ;;  %s1750_s17 = scalar_lea.hbm %s3016_s7, %s1965_s10 }
  0x78   : > { %v362_v6 = vld [vmem:[#allocation5 + $0x20] sm:$0xff]  ;;  %v368_v12 = vld [vmem:[#allocation5 + $0x50] sm:$0xff]  ;;  %v359_v18 = vld [vmem:[#allocation5 + $0x8] sm:$0xff]  ;;  %v2835_v23 = vpack.c.bf16 %v354_v11, %v353_v10  ;;  %v376_v8 = vlaneseq  ;;  %s1752_s20 = sshll.u32 %s351_s22, 4  ;;  %s1739_s18 = scalar_lea.sflag [#allocation4], %s2813_s15  ;;  %s1753_s20 = int_to_ptr.vmem [resolvable:$true] %s1752_s20 }
  0x79   : > { %v1875_v7 = vcombine.high %v358_v3, %v362_v6  ;;  %515 = vmatprep.subr.bf16.mxu1 %v1883_v4  ;;  %v1874_v13 = vcombine.low %v358_v3, %v362_v6  ;;  %v372_v14 = vld [vmem:[#allocation5 + $0x70] sm:$0xff]  ;;  %v363_v22 = vld [vmem:[#allocation5 + $0x28] sm:$0xff]  ;;  %v373_v28 = vld [vmem:[#allocation5 + $0x78] sm:$0xff]  ;;  %s2535_s13 = scalar_lea.vmem %s1753_s20, 128  ;;  %p3040_p8 = scmp.ne.s32.totalorder %s3030_s12, 0 }
  0x7a   : > { %516 = vmatpush1.bf16.msra.mxu1 %v1882_v5  ;;  %v360_v15 = vld [vmem:[#allocation5 + $0x10] sm:$0xff]  ;;  %v1887_v19 = vcombine.high %v368_v12, %v372_v14  ;;  %v1886_v20 = vcombine.low %v368_v12, %v372_v14  ;;  %v1877_v26 = vcombine.high %v359_v18, %v363_v22  ;;  %v2335_v29 = vld [vmem:[#allocation8 + $0x78] sm:$0xff]   ;;  %v1876_v31 = vcombine.low %v359_v18, %v363_v22  ;;  %v2337_v35 = vld [vmem:[#allocation8 + $0x70] sm:$0xff]   ;;  %p2536_p4 = scmp.ne.s32.totalorder %s1753_s20, %s2535_s13 }
  0x7b   : > { %v364_v16 = vld [vmem:[#allocation5 + $0x30] sm:$0xff]  ;;  %517 = vmatprep.subr.bf16.mxu1 %v1875_v7  ;;  %v355_v30 = vld [vmem:[%s2817_s16 + $0x10] sm:$0xff]  ;;  %v1889_v32 = vcombine.high %v369_v25, %v373_v28  ;;  %v2341_v41 = vld [vmem:[#allocation8 + $0x60] sm:$0xff]   ;;  %v1888_v42 = vcombine.low %v369_v25, %v373_v28  ;;  %v2856_v9 = vshrl.u32 %v376_v8, 7  ;;  %s2624_s16 = smov [#allocation11]  }
  0x7c   : > { %v1879_v21 = vcombine.high %v360_v15, %v364_v16  ;;  %617 = vmatprep.subr.bf16.mxu0 %v1887_v19  ;;  %v1878_v27 = vcombine.low %v360_v15, %v364_v16  ;;  %v2336_v33 = vld [vmem:[#allocation8 + $0x38] sm:$0xff]   ;;  %v357_v34 = vpack.c.bf16 %v355_v30, %v355_v30  ;;  %v2338_v36 = vld [vmem:[#allocation8 + $0x30] sm:$0xff]   ;;  %v2339_v37 = vld [vmem:[#allocation8 + $0x68] sm:$0xff]   ;;  %p2537_p12 = pnand %p2536_p4, %p3040_p8  ;;  %s2539_s30 = sshll.u32 %s2624_s16, 4  ;;  %s2540_s30 = int_to_ptr.vmem [resolvable:$false] %s2539_s30 }
  0x7d   : > { %618 = vmatpush1.bf16.msra.mxu0 %v1886_v20  ;;  %v361_v38 = vld [vmem:[#allocation5 + $0x18] sm:$0xff]  ;;  %v2340_v40 = vld [vmem:[#allocation8 + $0x28] sm:$0xff]   ;;  %v2342_v43 = vld [vmem:[#allocation8 + $0x20] sm:$0xff]   ;;  %v382_v10 = vsub.s32 1, %v2856_v9  ;;  %v378_v11 = vsub.s32 0, %v2856_v9  ;;  %s2541_s28 = scalar_lea.vmem %s2540_s30, 256  ;;  %p2542_p3 = scmp.lt.s32.totalorder %s1753_s20, %s2540_s30 }
  0x7e   : > { %518 = vmatpush1.bf16.msra.mxu1 %v1874_v13  ;;  %619 = vmatprep.subr.bf16.mxu0 %v1879_v21  ;;  %v365_v39 = vld [vmem:[#allocation5 + $0x38] sm:$0xff]  ;;  %v2343_v45 = vld [vmem:[#allocation8 + $0x58] sm:$0xff]   ;;  %v2351_v54 = vld [vmem:[#allocation8 + $0x48] sm:$0xff]   ;;  %p2538_p6 = pneg %p2537_p12  ;;  %p2543_p9 = scmp.lt.s32.totalorder %s2541_s28, %s2535_s13 }
  0x7f   : > { %566 = vmatprep.subr.bf16.mxu1 %v1885_v17  ;;  %v1881_v44 = vcombine.high %v361_v38, %v365_v39  ;;  %v2344_v46 = vld [vmem:[#allocation8 + $0xf8] sm:$0xff]   ;;  %v1880_v47 = vcombine.low %v361_v38, %v365_v39  ;;  %v2347_v50 = vld [vmem:[#allocation8 + $0x50] sm:$0xff]   ;;  %v2352_v55 = vld [vmem:[#allocation8 + $0xe8] sm:$0xff]   ;;  %v398_v17 = vsub.s32 5, %v2856_v9 }
  0x80   : > { %v2345_v48 = vld [vmem:[#allocation8 + $0x18] sm:$0xff]   ;;  %v2348_v51 = vld [vmem:[#allocation8 + $0xf0] sm:$0xff]   ;;  %v2353_v56 = vld [vmem:[#allocation8 + $0x8] sm:$0xff]   ;;  %p2544_p13 = por %p2543_p9, %p2542_p3 }
  0x81   : > { %1890 = vmatmul.mubr.msk.bf16.vlgmr.msra.gmra.mxu1 %vm496_vm0, %v2835_v23  ;;  %620 = vmatpush1.bf16.msra.mxu0 %v1878_v27  ;;  %v2346_v49 = vld [vmem:[#allocation8 + $0xb8] sm:$0xff]   ;;  %v2349_v52 = vld [vmem:[#allocation8 + $0x10] sm:$0xff]   ;;  %v2354_v57 = vld [vmem:[#allocation8 + $0xa8] sm:$0xff]  }
  0x82   : > { %567 = vmatpush1.bf16.msra.mxu1 %v1884_v24  ;;  %545 = vmatprep.mubr.bf16.mxu1 %v2621_v0  ;;  %v2350_v53 = vld [vmem:[#allocation8 + $0xb0] sm:$0xff]   ;;  %v2355_v58 = vld [vmem:[#allocation8 + $0x40] sm:$0xff]   ;;  %v2359_v62 = vld [vmem:[#allocation8 + $0xd8] sm:$0xff]   ;;  %p2545_p5 = pnand %p2544_p13, %p2538_p6 }
  0x83   : > { %568 = vmatprep.subr.bf16.mxu1 %v1877_v26  ;;  %1968 = vmatprep.subr.bf16.mxu0 %v2335_v29  ;;  %v2356_v59 = vld [vmem:[#allocation8 + $0xe0] sm:$0xff]   ;;  %v2360_v63 = vld [vmem:[#allocation8 + $0x178] sm:$0xff]   ;;  %v2363_v1 = vld [vmem:[#allocation8 + $0xd0] sm:$0xff]  }
  0x84   : > { %1894 = vmatmul.mubr.msk.bf16.vlgmr.msra.gmra.mxu0 %vm496_vm0, %v2835_v23  ;;  %v2357_v60 = vld [vmem:[#allocation8] sm:$0xff]   ;;  %v2365_v2 = vld [vmem:[#allocation8 + $0x90] sm:$0xff]   ;;  %v2367_v3 = vld [vmem:[#allocation8 + $0xc8] sm:$0xff]  }
  0x85   : > { %647 = vmatprep.mubr.bf16.mxu0 %v2621_v0  ;;  %1969 = vmatpush3.bf16.msra.mxu0 %v2336_v33  ;;  %v2358_v61 = vld [vmem:[#allocation8 + $0xa0] sm:$0xff]   ;;  %v2369_v4 = vld [vmem:[#allocation8 + $0x88] sm:$0xff]   ;;  %v2376_v7 = vld [vmem:[#allocation8 + $0x1f8] sm:$0xff]  }
  0x86   : > { %569 = vmatpush1.bf16.msra.mxu1 %v1876_v31  ;;  %1970 = vmatprep.subr.bf16.mxu0 %v2337_v35  ;;  %v2371_v5 = vld [vmem:[#allocation8 + $0xc0] sm:$0xff]   ;;  %v2860_v12 = vld [vmem:[#allocation7] sm:$0xff] }
  0x87   : > { %668 = vmatprep.subr.bf16.mxu1 %v1889_v32  ;;  %v2373_v6 = vld [vmem:[#allocation8 + $0x80] sm:$0xff]   ;;  %v383_v14 = vrot.slane %v2860_v12, %v382_v10  ;;  %v379_v15 = vrot.slane %v2860_v12, %v378_v11  ;;  %v2868_v25 = vrot.slane %v2860_v12, %v398_v17 }
  0x88   : > { %v2374_v8 = vld [vmem:[#allocation8 + $0x120] sm:$0xff]  }
  0x89   : > { %1891 = vmatmul.mubr.msk.bf16.gmra.mxu1 %vm496_vm0, %v357_v34  ;;  %1971 = vmatpush3.bf16.msra.mxu0 %v2338_v36  ;;  %v2362_v36 = vld [vmem:[#allocation8 + $0x138] sm:$0xff]  }
  0x8a   : > { %586 = vmatprep.mubr.bf16.mxu1 %v2621_v0  ;;  %1972 = vmatprep.subr.bf16.mxu0 %v2339_v37 }
  0x8c   : > { %1895 = vmatmul.mubr.msk.bf16.gmra.mxu0 %vm496_vm0, %v357_v34 }
  0x8d   : > { %1973 = vmatpush3.bf16.msra.mxu0 %v2340_v40 }
  0x8e   : > { %1974 = vmatprep.subr.bf16.mxu0 %v2341_v41 }
  0x91   : > { %1892 = vmatmul.mubr.msk.bf16.vlgmr.msra.gmra.mxu1 %vm496_vm0, %v2835_v23  ;;  %1975 = vmatpush3.bf16.msra.mxu0 %v2342_v43 }
  0x92   : > { %596 = vmatprep.mubr.bf16.mxu1 %v2621_v0  ;;  %669 = vmatpush1.bf16.msra.mxu1 %v1888_v42  ;;  %v2364_v42 = vld [vmem:[#allocation8 + $0x170] sm:$0xff]  }
  0x93   : > { %670 = vmatprep.subr.bf16.mxu1 %v1881_v44  ;;  %1976 = vmatprep.subr.bf16.mxu0 %v2343_v45  ;;  %v390_v45 = vsub.s32 3, %v2856_v9 }
  0x95   : > { %1977 = vmatpush3.bf16.msra.mxu0 %v2345_v48  ;;  %v386_v48 = vsub.s32 2, %v2856_v9 }
  0x96   : > { %671 = vmatpush1.bf16.msra.mxu1 %v1880_v47  ;;  %1978 = vmatprep.subr.bf16.mxu0 %v2347_v50  ;;  %v2366_v50 = vld [vmem:[#allocation8 + $0x130] sm:$0xff]  }
  0x97   : > { %1996 = vmatprep.subr.bf16.mxu1 %v2344_v46 }
  0x99   : > { %1893 = vmatmul.mubr.msk.bf16.gmra.mxu1 %vm496_vm0, %v357_v34  ;;  %1979 = vmatpush3.bf16.msra.mxu0 %v2349_v52 }
  0x9a   : > { %688 = vmatprep.mubr.bf16.mxu1 %v2621_v0  ;;  %1980 = vmatprep.subr.bf16.mxu0 %v2351_v54 }
  0x9d   : > { %1981 = vmatpush3.bf16.msra.mxu0 %v2353_v56  ;;  %v2368_v56 = vld [vmem:[#allocation8 + $0x168] sm:$0xff]  }
  0x9e   : > { %1982 = vmatprep.subr.bf16.mxu0 %v2355_v58 }
  0xa1   : > { %1896 = vmatmul.mubr.msk.bf16.vlgmr.msra.gmra.mxu1 %vm496_vm0, %v2835_v23  ;;  %1983 = vmatpush3.bf16.msra.mxu0 %v2357_v60 }
  0xa2   : > { %698 = vmatprep.mubr.bf16.mxu1 %v2621_v0  ;;  %1997 = vmatpush3.bf16.msra.mxu1 %v2346_v49  ;;  %v2361_v0 = vld [vmem:[#allocation8 + $0x98] sm:$0xff]  }
  0xa3   : > { %1998 = vmatprep.subr.bf16.mxu1 %v2348_v51  ;;  %2024 = vmatprep.subr.bf16.mxu0 %v2360_v63 }
  0xa6   : > { %1999 = vmatpush3.bf16.msra.mxu1 %v2350_v53 }
  0xa7   : > { %2000 = vmatprep.subr.bf16.mxu1 %v2352_v55 }
  0xa9   : > { %1897 = vmatmul.mubr.msk.bf16.gmra.mxu1 %vm496_vm0, %v357_v34 }
  0xaa   : > { %2001 = vmatpush3.bf16.msra.mxu1 %v2354_v57  ;;  %v391_v57 = vrot.slane %v2860_v12, %v390_v45 }
  0xab   : > { %2002 = vmatprep.subr.bf16.mxu1 %v2356_v59  ;;  %v387_v59 = vrot.slane %v2860_v12, %v386_v48  ;;  %v2385_v48 = vld [vmem:[#allocation8 + $0x108] sm:$0xff]  }
  0xae   : > { %2003 = vmatpush3.bf16.msra.mxu1 %v2358_v61  ;;  %v2370_v61 = vld [vmem:[#allocation8 + $0x128] sm:$0xff]  }
  0xaf   : > { %2004 = vmatprep.subr.bf16.mxu1 %v2359_v62 }
  0xb2   : > { %2005 = vmatpush3.bf16.msra.mxu1 %v2361_v0 }
  0xb3   : > { %2006 = vmatprep.subr.bf16.mxu1 %v2363_v1 }
  0xb6   : > { %2007 = vmatpush3.bf16.msra.mxu1 %v2365_v2  ;;  %v2372_v2 = vld [vmem:[#allocation8 + $0x160] sm:$0xff]  }
  0xb7   : > { %2008 = vmatprep.subr.bf16.mxu1 %v2367_v3 }
  0xba   : > { %2009 = vmatpush3.bf16.msra.mxu1 %v2369_v4 }
  0xbb   : > { %2010 = vmatprep.subr.bf16.mxu1 %v2371_v5 }
  0xbe   : > { %2011 = vmatpush3.bf16.msra.mxu1 %v2373_v6 }
  0xbf   : > { %2052 = vmatprep.subr.bf16.mxu1 %v2376_v7 }
 0x141   : > { %v537_v13 = vpop.f32.mrf.mxu1 }
 0x142   : > { %v538_v22 = vadd.f32 %v537_v13, %v379_v15  ;;  %v2375_v13 = vld [vmem:[#allocation8 + $0x158] sm:$0xff]  }
 0x143   : > { %v539_v16 = vpop.f32.mrf.mxu1 }
 0x144   : > { %v540_v19 = vadd.f32 %v539_v16, %v383_v14  ;;  %v2865_v21 = vpop.f32.mrf.mxu0  ;;  %v707_v32 = vmax.f32 %v538_v22, 0.0 }
 0x145   : > { %v541_v18 = vpop.f32.mrf.mxu1 }
 0x146   : > { %v542_v20 = vadd.f32 %v541_v18, %v379_v15  ;;  %v641_v26 = vpop.f32.mrf.mxu0  ;;  %v708_v29 = vmax.f32 %v540_v19, 0.0  ;;  %v394_v19 = vsub.s32 4, %v2856_v9 }
 0x147   : > { %v543_v23 = vpop.f32.mrf.mxu1  ;;  %v642_v37 = vadd.f32 %v641_v26, %v2868_v25  ;;  %v406_v26 = vsub.s32 7, %v2856_v9 }
 0x148   : > { %v544_v24 = vadd.f32 %v543_v23, %v383_v14  ;;  %v715_v27 = vmax.f32 %v542_v20, 0.0  ;;  %v2870_v31 = vpop.f32.mrf.mxu0  ;;  %v2377_v23 = vld [vmem:[#allocation8 + $0x118] sm:$0xff]  }
 0x149   : > { %v547_v28 = vpop.f32.mrf.mxu1  ;;  %v712_v51 = vmax.f32 %v642_v37, 0.0  ;;  %v2381_v37 = vld [vmem:[#allocation8 + $0x110] sm:$0xff]  }
 0x14a   : > { %v716_v30 = vmax.f32 %v544_v24, 0.0  ;;  %v645_v38 = vpop.f32.mrf.mxu0  ;;  %v731_v39 = vpack.c.bf16 %v715_v27, %v707_v32  ;;  %v548_v40 = vadd.f32 %v547_v28, %v379_v15  ;;  %v2378_v24 = vld [vmem:[#allocation8 + $0x1b8] sm:$0xff]   ;;  %v2379_v28 = vld [vmem:[#allocation8 + $0x150] sm:$0xff]  }
 0x14b   : > { %v549_v33 = vpop.f32.mrf.mxu1  ;;  %v646_v43 = vadd.f32 %v645_v38, %v2868_v25  ;;  %v2382_v38 = vld [vmem:[#allocation8 + $0x1b0] sm:$0xff]  }
 0x14c   : > { %v732_v34 = vpack.c.bf16 %v716_v30, %v708_v29  ;;  %v550_v35 = vadd.f32 %v549_v33, %v383_v14  ;;  %v2875_v46 = vpop.f32.mrf.mxu0  ;;  %v723_v54 = vmax.f32 %v548_v40, 0.0  ;;  %v2380_v29 = vld [vmem:[#allocation8 + $0x1f0] sm:$0xff]   ;;  %v2383_v40 = vld [vmem:[#allocation8 + $0x148] sm:$0xff]  }
 0x14d   : > { %v551_v41 = vpop.f32.mrf.mxu1  ;;  %v720_v52 = vmax.f32 %v646_v43, 0.0 }
 0x14e   : > { %v724_v44 = vmax.f32 %v550_v35, 0.0  ;;  %1298 = vmatprep.mubr.bf16.mxu0 %v732_v34  ;;  %v2878_v53 = vpop.f32.mrf.mxu0  ;;  %v739_v0 = vpack.c.bf16 %v723_v54, %v723_v54  ;;  %v395_v34 = vrot.slane %v2860_v12, %v394_v19  ;;  %v2384_v41 = vld [vmem:[#allocation8 + $0x1e8] sm:$0xff]   ;;  %v2388_v54 = vld [vmem:[#allocation8 + $0x1e0] sm:$0xff]  }
 0x14f   : > { %v552_v47 = vpop.f32.mrf.mxu1  ;;  %1299 = vmatmul.mubr.bf16.vlgmr.msra.gmra.mxu0 %v731_v39  ;;  %v736_v62 = vpack.c.bf16 %v720_v52, %v712_v51  ;;  %v2886_v39 = vrot.slane %v2860_v12, %v406_v26  ;;  %v652_v51 = vadd.f32 %v2878_v53, %v2868_v25  ;;  %v2387_v52 = vld [vmem:[#allocation8 + $0x140] sm:$0xff]   ;;  %v2391_v25 = vld [vmem:[#allocation8 + $0x1d8] sm:$0xff]  }
 0x150   : > { %v740_v49 = vpack.c.bf16 %v724_v44, %v724_v44  ;;  %2025 = vmatpush3.bf16.msra.mxu0 %v2362_v36  ;;  %v653_v58 = vpop.f32.mrf.mxu0  ;;  %v640_v44 = vadd.f32 %v2865_v21, %v395_v34  ;;  %v644_v45 = vadd.f32 %v2870_v31, %v395_v34  ;;  %v2389_v31 = vld [vmem:[#allocation8 + $0x100] sm:$0xff]  }
 0x151   : > { %v588_v55 = vpop.f32.mrf.mxu1  ;;  %2026 = vmatprep.subr.bf16.mxu0 %v2364_v42  ;;  %v2390_v58 = vld [vmem:[#allocation8 + $0x1a0] sm:$0xff]  }
 0x152   : > { %1306 = vmatprep.mubr.bf16.mxu0 %v740_v49  ;;  %v654_v63 = vpop.f32.mrf.mxu0  ;;  %v589_v5 = vadd.f32 %v588_v55, %v387_v59  ;;  %v2386_v49 = vld [vmem:[#allocation8 + $0x1a8] sm:$0xff]   ;;  %v2398_v19 = vld [vmem:[#allocation8 + $0x180] sm:$0xff]  }
 0x153   : > { %v590_v60 = vpop.f32.mrf.mxu1 }
 0x154   : > { %2027 = vmatpush3.bf16.msra.mxu0 %v2366_v50  ;;  %v591_v3 = vadd.f32 %v590_v60, %v391_v57  ;;  %v709_v16 = vmax.f32 %v589_v5, 0.0  ;;  %v728_v60 = vmax.f32 %v652_v51, 0.0  ;;  %v402_v5 = vsub.s32 6, %v2856_v9  ;;  %v1466_v51 = vld [vmem:[#allocation10 + $0x28] sm:$0xff] }
 0x155   : > { %v592_v1 = vpop.f32.mrf.mxu1  ;;  %2028 = vmatprep.subr.bf16.mxu0 %v2368_v56  ;;  %v711_v56 = vmax.f32 %v640_v44, 0.0  ;;  %v1469_v44 = vld [vmem:[#allocation10 + $0x40] sm:$0xff] }
 0x156   : > { %v593_v4 = vadd.f32 %v592_v1, %v387_v59  ;;  %v710_v14 = vmax.f32 %v591_v3, 0.0  ;;  %v2392_v3 = vld [vmem:[#allocation8 + $0x198] sm:$0xff]  }
 0x157   : > { %v594_v6 = vpop.f32.mrf.mxu1  ;;  %1307 = vmatmul.mubr.bf16.gmra.mxu0 %v739_v0  ;;  %v650_v0 = vadd.f32 %v2875_v46, %v395_v34  ;;  %v403_v46 = vrot.slane %v2860_v12, %v402_v5  ;;  %v1474_v34 = vld [vmem:[#allocation10 + $0x68] sm:$0xff] }
 0x158   : > { %v595_v7 = vadd.f32 %v594_v6, %v391_v57  ;;  %2029 = vmatpush3.bf16.msra.mxu0 %v2370_v61  ;;  %1394 = vmatprep.mubr.bf16.mxu0 %v736_v62  ;;  %v717_v10 = vmax.f32 %v593_v4, 0.0  ;;  %v2393_v6 = vld [vmem:[#allocation8 + $0x1d0] sm:$0xff]  }
 0x159   : > { %2030 = vmatprep.subr.bf16.mxu0 %v2372_v2  ;;  %v598_v11 = vpop.f32.mrf.mxu1  ;;  %v744_v2 = vpack.c.bf16 %v728_v60, %v728_v60  ;;  %v1461_v60 = vld [vmem:[#allocation10] sm:$0xff] }
 0x15a   : > { %v718_v15 = vmax.f32 %v595_v7, 0.0  ;;  %v599_v17 = vadd.f32 %v598_v11, %v387_v59  ;;  %v733_v27 = vpack.c.bf16 %v717_v10, %v709_v16  ;;  %v2394_v11 = vld [vmem:[#allocation8 + $0x190] sm:$0xff]  }
 0x15b   : > { %v600_v18 = vpop.f32.mrf.mxu1 }
 0x15c   : > { %v734_v20 = vpack.c.bf16 %v718_v15, %v710_v14  ;;  %2031 = vmatpush3.bf16.msra.mxu0 %v2374_v8  ;;  %v601_v22 = vadd.f32 %v600_v18, %v391_v57  ;;  %v725_v33 = vmax.f32 %v599_v17, 0.0  ;;  %v719_v57 = vmax.f32 %v644_v45, 0.0  ;;  %v2396_v15 = vld [vmem:[#allocation8 + $0x188] sm:$0xff]   ;;  %v2397_v18 = vld [vmem:[#allocation8 + $0x1c0] sm:$0xff]  }
 0x15d   : > { %2032 = vmatprep.subr.bf16.mxu0 %v2375_v13  ;;  %v602_v30 = vpop.f32.mrf.mxu1  ;;  %v727_v8 = vmax.f32 %v650_v0, 0.0  ;;  %v2395_v13 = vld [vmem:[#allocation8 + $0x1c8] sm:$0xff]  }
 0x15e   : > { %1346 = vmatprep.mubr.bf16.mxu1 %v734_v20  ;;  %v726_v32 = vmax.f32 %v601_v22, 0.0  ;;  %v741_v43 = vpack.c.bf16 %v725_v33, %v725_v33  ;;  %v735_v63 = vpack.c.bf16 %v719_v57, %v711_v56  ;;  %v1476_v30 = vld [vmem:[#allocation10 + $0x78] sm:$0xff]  ;;  %v1486_v45 = vld [vmem:[#allocation10 + $0xc8] sm:$0xff]  ;;  %v1481_v57 = vld [vmem:[#allocation10 + $0xa0] sm:$0xff] }
 0x15f   : > { %1347 = vmatmul.mubr.bf16.vlgmr.msra.gmra.mxu1 %v733_v27  ;;  %v603_v35 = vpop.f32.mrf.mxu1  ;;  %v743_v14 = vpack.c.bf16 %v727_v8, %v727_v8  ;;  %v1492_v33 = vld [vmem:[#allocation10 + $0xf8] sm:$0xff] }
 0x160   : > { %v742_v36 = vpack.c.bf16 %v726_v32, %v726_v32  ;;  %2033 = vmatpush3.bf16.msra.mxu0 %v2377_v23  ;;  %2053 = vmatpush3.bf16.msra.mxu1 %v2378_v24  ;;  %v1475_v32 = vld [vmem:[#allocation10 + $0x70] sm:$0xff]  ;;  %v1464_v56 = vld [vmem:[#allocation10 + $0x18] sm:$0xff] }
 0x161   : > { %2034 = vmatprep.subr.bf16.mxu0 %v2379_v28  ;;  %2054 = vmatprep.subr.bf16.mxu1 %v2380_v29  ;;  %v690_v42 = vpop.f32.mrf.mxu1  ;;  %v2622_v29 = vmov 0.0   ;;  %v1491_v35 = vld [vmem:[#allocation10 + $0xf0] sm:$0xff] }
 0x162   : > { %1354 = vmatprep.mubr.bf16.mxu1 %v742_v36  ;;  %v691_v9 = vadd.f32 %v690_v42, %v403_v46  ;;  %v1473_v36 = vld [vmem:[#allocation10 + $0x60] sm:$0xff]  ;;  %v1470_v42 = vld [vmem:[#allocation10 + $0x48] sm:$0xff] }
 0x163   : > { %v692_v47 = vpop.f32.mrf.mxu1 }
 0x164   : > { %2035 = vmatpush3.bf16.msra.mxu0 %v2381_v37  ;;  %2055 = vmatpush3.bf16.msra.mxu1 %v2382_v38  ;;  %v693_v50 = vadd.f32 %v692_v47, %v2886_v39  ;;  %v713_v22 = vmax.f32 %v691_v9, 0.0  ;;  %v1490_v37 = vld [vmem:[#allocation10 + $0xe8] sm:$0xff]  ;;  %v1472_v38 = vld [vmem:[#allocation10 + $0x58] sm:$0xff] }
 0x165   : > { %2036 = vmatprep.subr.bf16.mxu0 %v2383_v40  ;;  %2056 = vmatprep.subr.bf16.mxu1 %v2384_v41  ;;  %v694_v55 = vpop.f32.mrf.mxu1  ;;  %v1471_v40 = vld [vmem:[#allocation10 + $0x50] sm:$0xff]  ;;  %v1488_v41 = vld [vmem:[#allocation10 + $0xd8] sm:$0xff] }
 0x166   : > { %v714_v59 = vmax.f32 %v693_v50, 0.0  ;;  %v695_v17 = vadd.f32 %v694_v55, %v403_v46  ;;  %v1468_v47 = vld [vmem:[#allocation10 + $0x38] sm:$0xff]  ;;  %v1482_v55 = vld [vmem:[#allocation10 + $0xa8] sm:$0xff] }
 0x167   : > { %1355 = vmatmul.mubr.bf16.gmra.mxu1 %v741_v43  ;;  %v696_v21 = vpop.f32.mrf.mxu1  ;;  %v1487_v43 = vld [vmem:[#allocation10 + $0xd0] sm:$0xff]  ;;  %v1484_v50 = vld [vmem:[#allocation10 + $0xb8] sm:$0xff] }
 0x168   : > { %2037 = vmatpush3.bf16.msra.mxu0 %v2385_v48  ;;  %2057 = vmatpush3.bf16.msra.mxu1 %v2386_v49  ;;  %v697_v61 = vadd.f32 %v696_v21, %v2886_v39  ;;  %v721_v23 = vmax.f32 %v695_v17, 0.0  ;;  %v1485_v48 = vld [vmem:[#allocation10 + $0xc0] sm:$0xff]  ;;  %v1467_v49 = vld [vmem:[#allocation10 + $0x30] sm:$0xff] }
 0x169   : > { %2038 = vmatprep.subr.bf16.mxu0 %v2387_v52  ;;  %2058 = vmatprep.subr.bf16.mxu1 %v2388_v54  ;;  %v700_v53 = vpop.f32.mrf.mxu1  ;;  %v1483_v52 = vld [vmem:[#allocation10 + $0xb0] sm:$0xff]  ;;  %v1465_v54 = vld [vmem:[#allocation10 + $0x20] sm:$0xff] }
 0x16a   : > { %v722_v62 = vmax.f32 %v697_v61, 0.0  ;;  %v701_v24 = vadd.f32 %v700_v53, %v403_v46  ;;  %v737_v26 = vpack.c.bf16 %v721_v23, %v713_v22  ;;  %v1463_v21 = vld [vmem:[#allocation10 + $0x10] sm:$0xff]  ;;  %v1478_v61 = vld [vmem:[#allocation10 + $0x88] sm:$0xff] }
 0x16b   : > { %v702_v1 = vpop.f32.mrf.mxu1  ;;  %v1898_v22 = vld [vmem:[%s3013_s4] ss:$0 sm:$0xff] }
 0x16c   : > { %2039 = vmatpush3.bf16.msra.mxu0 %v2389_v31  ;;  %2059 = vmatpush3.bf16.msra.mxu1 %v2390_v58  ;;  %v738_v4 = vpack.c.bf16 %v722_v62, %v714_v59  ;;  %v703_v16 = vadd.f32 %v702_v1, %v2886_v39  ;;  %v729_v27 = vmax.f32 %v701_v24, 0.0  ;;  %v1489_v39 = vld [vmem:[#allocation10 + $0xe0] sm:$0xff]  ;;  %v1480_v31 = vld [vmem:[#allocation10 + $0x98] sm:$0xff]  ;;  %v1462_v58 = vld [vmem:[#allocation10 + $0x8] sm:$0xff] }
 0x16d   : > { %2060 = vmatprep.subr.bf16.mxu1 %v2391_v25  ;;  %v704_v7 = vpop.f32.mrf.mxu1  ;;  %2131 = vmatprep.subr.mxu0 %v2622_v29  ;;  %v1479_v59 = vld [vmem:[#allocation10 + $0x90] sm:$0xff]  ;;  %v1477_v25 = vld [vmem:[#allocation10 + $0x80] sm:$0xff] }
 0x16e   : > { %1442 = vmatprep.mubr.bf16.mxu1 %v738_v4  ;;  %v730_v20 = vmax.f32 %v703_v16, 0.0  ;;  %v745_v28 = vpack.c.bf16 %v729_v27, %v729_v27 }
 0x16f   : > { %1395 = vmatmul.mubr.bf16.vlgmr.msra.gmra.mxu0 %v735_v63  ;;  %v705_v10 = vpop.f32.mrf.mxu1 }
 0x170   : > { %2061 = vmatpush3.bf16.msra.mxu1 %v2392_v3  ;;  %1402 = vmatprep.mubr.bf16.mxu0 %v744_v2  ;;  %v746_v12 = vpack.c.bf16 %v730_v20, %v730_v20 }
 0x171   : > { %2062 = vmatprep.subr.bf16.mxu1 %v2393_v6  ;;  %2132 = vmatpush3.msra.mxu0 %v1492_v33 }
 0x172   : > { %2133 = vmatprep.subr.mxu0 %v2622_v29 }
 0x173   : > { %2134 = vmatpush3.msra.mxu0 %v1491_v35 }
 0x174   : > { %2063 = vmatpush3.bf16.msra.mxu1 %v2394_v11  ;;  %2135 = vmatprep.subr.mxu0 %v2622_v29 }
 0x175   : > { %2064 = vmatprep.subr.bf16.mxu1 %v2395_v13  ;;  %2136 = vmatpush3.msra.mxu0 %v1490_v37 }
 0x176   : > { %2137 = vmatprep.subr.mxu0 %v2622_v29 }
 0x177   : > { %1403 = vmatmul.mubr.bf16.gmra.mxu0 %v743_v14 }
 0x178   : > { %2065 = vmatpush3.bf16.msra.mxu1 %v2396_v15  ;;  %2138 = vmatpush3.msra.mxu0 %v1489_v39 }
 0x179   : > { %2066 = vmatprep.subr.bf16.mxu1 %v2397_v18  ;;  %2139 = vmatprep.subr.mxu0 %v2622_v29 }
 0x17a   : > { %2140 = vmatpush3.msra.mxu0 %v1488_v41  ;;  %2163 = vmatprep.mubr.msk.f32.mxu0 %vm2623_vm1, %v2622_v29 }
 0x17b   : > { %2141 = vmatprep.subr.mxu0 %v2622_v29 }
 0x17c   : > { %2067 = vmatpush3.bf16.msra.mxu1 %v2398_v19  ;;  %2142 = vmatpush3.msra.mxu0 %v1487_v43 }
 0x17d   : > { %2166 = vmatprep.subr.mxu1 %v2622_v29  ;;  %2143 = vmatprep.subr.mxu0 %v2622_v29 }
 0x17e   : > { %2144 = vmatpush3.msra.mxu0 %v1486_v45 }
 0x17f   : > { %1443 = vmatmul.mubr.bf16.vlgmr.msra.gmra.mxu1 %v737_v26  ;;  %2145 = vmatprep.subr.mxu0 %v2622_v29 }
 0x180   : > { %1450 = vmatprep.mubr.bf16.mxu1 %v746_v12  ;;  %2167 = vmatpush3.msra.mxu1 %v1476_v30 }
 0x181   : > { %2168 = vmatprep.subr.mxu1 %v2622_v29  ;;  %2146 = vmatpush3.msra.mxu0 %v1485_v48 }
 0x182   : > { %2169 = vmatpush3.msra.mxu1 %v1475_v32  ;;  %2147 = vmatprep.subr.mxu0 %v2622_v29 }
 0x183   : > { %2170 = vmatprep.subr.mxu1 %v2622_v29  ;;  %2148 = vmatpush3.msra.mxu0 %v1484_v50 }
 0x184   : > { %2171 = vmatpush3.msra.mxu1 %v1474_v34  ;;  %2149 = vmatprep.subr.mxu0 %v2622_v29 }
 0x185   : > { %2172 = vmatprep.subr.mxu1 %v2622_v29  ;;  %2150 = vmatpush3.msra.mxu0 %v1483_v52 }
 0x186   : > { %2173 = vmatpush3.msra.mxu1 %v1473_v36  ;;  %2151 = vmatprep.subr.mxu0 %v2622_v29 }
 0x187   : > { %1451 = vmatmul.mubr.bf16.gmra.mxu1 %v745_v28  ;;  %2174 = vmatprep.subr.mxu1 %v2622_v29 }
 0x188   : > { %2175 = vmatpush3.msra.mxu1 %v1472_v38  ;;  %2152 = vmatpush3.msra.mxu0 %v1482_v55 }
 0x189   : > { %2176 = vmatprep.subr.mxu1 %v2622_v29  ;;  %2153 = vmatprep.subr.mxu0 %v2622_v29 }
 0x18a   : > { %2177 = vmatpush3.msra.mxu1 %v1471_v40  ;;  %2154 = vmatpush3.msra.mxu0 %v1481_v57  ;;  %v1645_v57 = vld [vmem:[#allocation10 + $0x160] sm:$0xff] }
 0x18b   : > { %2178 = vmatprep.subr.mxu1 %v2622_v29  ;;  %2155 = vmatprep.subr.mxu0 %v2622_v29 }
 0x18c   : > { %2179 = vmatpush3.msra.mxu1 %v1470_v42  ;;  %2156 = vmatpush3.msra.mxu0 %v1480_v31  ;;  %v1643_v31 = vld [vmem:[#allocation10 + $0x150] sm:$0xff] }
 0x18d   : > { %2180 = vmatprep.subr.mxu1 %v2622_v29  ;;  %2157 = vmatprep.subr.mxu0 %v2622_v29 }
 0x18e   : > { %2181 = vmatpush3.msra.mxu1 %v1469_v44  ;;  %2158 = vmatpush3.msra.mxu0 %v1479_v59  ;;  %v1641_v59 = vld [vmem:[#allocation10 + $0x140] sm:$0xff] }
 0x18f   : > { %2182 = vmatprep.subr.mxu1 %v2622_v29  ;;  %2159 = vmatprep.subr.mxu0 %v2622_v29 }
 0x190   : > { %2183 = vmatpush3.msra.mxu1 %v1468_v47  ;;  %2198 = vmatprep.mubr.msk.f32.mxu1 %vm2623_vm1, %v2622_v29 }
 0x191   : > { %2184 = vmatprep.subr.mxu1 %v2622_v29  ;;  %2160 = vmatpush3.msra.mxu0 %v1478_v61  ;;  %v1639_v61 = vld [vmem:[#allocation10 + $0x130] sm:$0xff] }
 0x192   : > { %2185 = vmatpush3.msra.mxu1 %v1467_v49  ;;  %2161 = vmatprep.subr.mxu0 %v2622_v29 }
 0x193   : > { %2186 = vmatprep.subr.mxu1 %v2622_v29  ;;  %2162 = vmatpush3.msra.mxu0 %v1477_v25 }
 0x194   : > { %2187 = vmatpush3.msra.mxu1 %v1466_v51  ;;  %2201 = vmatprep.subr.mxu0 %v2622_v29  ;;  %v1648_v51 = vld [vmem:[#allocation10 + $0x178] sm:$0xff] }
 0x195   : > { %2188 = vmatprep.subr.mxu1 %v2622_v29 }
 0x196   : > { %2189 = vmatpush3.msra.mxu1 %v1465_v54  ;;  %v1647_v54 = vld [vmem:[#allocation10 + $0x170] sm:$0xff] }
 0x197   : > { %2190 = vmatprep.subr.mxu1 %v2622_v29 }
 0x198   : > { %2191 = vmatpush3.msra.mxu1 %v1464_v56  ;;  %v1646_v56 = vld [vmem:[#allocation10 + $0x168] sm:$0xff] }
 0x199   : > { %2192 = vmatprep.subr.mxu1 %v2622_v29 }
 0x19a   : > { %2193 = vmatpush3.msra.mxu1 %v1463_v21  ;;  %v1644_v21 = vld [vmem:[#allocation10 + $0x158] sm:$0xff] }
 0x19b   : > { %2194 = vmatprep.subr.mxu1 %v2622_v29 }
 0x19c   : > { %2195 = vmatpush3.msra.mxu1 %v1462_v58  ;;  %v1642_v58 = vld [vmem:[#allocation10 + $0x148] sm:$0xff] }
 0x19d   : > { %2196 = vmatprep.subr.mxu1 %v2622_v29 }
 0x19e   : > { %2197 = vmatpush3.msra.mxu1 %v1461_v60  ;;  %v1640_v60 = vld [vmem:[#allocation10 + $0x138] sm:$0xff] }
 0x20f   : > { %v1984_v53 = vpop.f32.mrf.mxu0 }
 0x211   : > { %v1985_v62 = vpop.f32.mrf.mxu0 }
 0x212   : > { %v1986_v20 = vadd.f32 %v1985_v62, %v1984_v53  ;;  %v1638_v53 = vld [vmem:[#allocation10 + $0x128] sm:$0xff] }
 0x213   : > { %v1987_v63 = vpop.f32.mrf.mxu0 }
 0x214   : > { %v1301_v26 = vadd.f32 %v1986_v20, %v1898_v22 }
 0x215   : > { %v1988_v0 = vpop.f32.mrf.mxu0 }
 0x216   : > { %v1989_v27 = vadd.f32 %v1988_v0, %v1987_v63  ;;  %v1637_v0 = vld [vmem:[#allocation10 + $0x120] sm:$0xff] }
 0x217   : > { %v1990_v1 = vpop.f32.mrf.mxu0 }
 0x218   : > { %v1304_v35 = vadd.f32 %v1989_v27, %v1898_v22 }
 0x219   : > { %v1991_v2 = vpop.f32.mrf.mxu0 }
 0x21a   : > { %v2935_v3 = vadd.f32 %v1991_v2, %v1990_v1 }
 0x21b   : > { %v1993_v4 = vpop.f32.mrf.mxu0 }
 0x21c   : > { %v1309_v62 = vadd.f32 %v2935_v3, %v1898_v22  ;;  %v1636_v4 = vld [vmem:[#allocation10 + $0x118] sm:$0xff]  ;;  %v1634_v3 = vld [vmem:[#allocation10 + $0x108] sm:$0xff] }
 0x21d   : > { %v1994_v5 = vpop.f32.mrf.mxu0 }
 0x21f   : > { %v2012_v6 = vpop.f32.mrf.mxu1 }
 0x221   : > { %v2013_v7 = vpop.f32.mrf.mxu1 }
 0x222   : > { %v2014_v24 = vadd.f32 %v2013_v7, %v2012_v6  ;;  %v1635_v6 = vld [vmem:[#allocation10 + $0x110] sm:$0xff] }
 0x223   : > { %v2015_v8 = vpop.f32.mrf.mxu1 }
 0x224   : > { %v1349_v32 = vadd.f32 %v2014_v24, %v1301_v26 }
 0x225   : > { %v2016_v10 = vpop.f32.mrf.mxu1 }
 0x226   : > { %v2017_v33 = vadd.f32 %v2016_v10, %v2015_v8  ;;  %v1633_v8 = vld [vmem:[#allocation10 + $0x100] sm:$0xff] }
 0x227   : > { %v2937_v11 = vpop.f32.mrf.mxu1 }
 0x228   : > { %v1352_v40 = vadd.f32 %v2017_v33, %v1304_v35 }
 0x229   : > { %v2939_v46 = vpop.f32.mrf.mxu1 }
 0x22a   : > { %v2020_v25 = vadd.f32 %v2939_v46, %v2937_v11 }
 0x22b   : > { %v2021_v13 = vpop.f32.mrf.mxu1 }
 0x22c   : > { %v1357_v1 = vadd.f32 %v2020_v25, %v1309_v62 }
 0x22d   : > { %v2022_v14 = vpop.f32.mrf.mxu1 }
 0x22f   : > { %v2040_v15 = vpop.f32.mrf.mxu0 }
 0x231   : > { %v2041_v16 = vpop.f32.mrf.mxu0 }
 0x232   : > { %v2042_v28 = vadd.f32 %v2041_v16, %v2040_v15 }
 0x233   : > { %v2043_v9 = vpop.f32.mrf.mxu0 }
 0x234   : > { %v1397_v36 = vadd.f32 %v2042_v28, %v1349_v32 }
 0x235   : > { %v2044_v17 = vpop.f32.mrf.mxu0 }
 0x236   : > { %v2045_v37 = vadd.f32 %v2044_v17, %v2043_v9  ;;  %v1963_v9 = vld [vmem:[%s3015_s6] ss:$0 sm:$0xff] }
 0x237   : > { %v2941_v18 = vpop.f32.mrf.mxu0 }
 0x238   : > { %v1400_v43 = vadd.f32 %v2045_v37, %v1352_v40 }
 0x239   : > { %v2943_v19 = vpop.f32.mrf.mxu0 }
 0x23a   : > { %v2048_v63 = vadd.f32 %v2943_v19, %v2941_v18 }
 0x23b   : > { %v2049_v23 = vpop.f32.mrf.mxu0 }
 0x23c   : > { %v1405_v5 = vadd.f32 %v2048_v63, %v1357_v1 }
 0x23d   : > { %v2050_v12 = vpop.f32.mrf.mxu0 }
 0x23f   : > { %v2068_v30 = vpop.f32.mrf.mxu1 }
 0x241   : > { %v2069_v34 = vpop.f32.mrf.mxu1 }
 0x242   : > { %v2070_v38 = vadd.f32 %v2069_v34, %v2068_v30 }
 0x243   : > { %v2071_v39 = vpop.f32.mrf.mxu1 }
 0x244   : > { %v1445_v41 = vadd.f32 %v2070_v38, %v1397_v36 }
 0x245   : > { %v2072_v42 = vpop.f32.mrf.mxu1 }
 0x246   : > { %v1458_v44 = vmax.f32 %v1445_v41, 0.0  ;;  %v2073_v45 = vadd.f32 %v2072_v42, %v2071_v39 }
 0x247   : > { %v2074_v47 = vpop.f32.mrf.mxu1 }
 0x248   : > { %v1448_v48 = vadd.f32 %v2073_v45, %v1400_v43  ;;  %2199 = vmatmul.mubr.f32.vlgmr.msra.gmra.mxu1 %v1458_v44 }
 0x249   : > { %v2075_v49 = vpop.f32.mrf.mxu1 }
 0x24a   : > { %v1459_v50 = vmax.f32 %v1448_v48, 0.0  ;;  %v2076_v2 = vadd.f32 %v2075_v49, %v2074_v47 }
 0x24b   : > { %v2077_v52 = vpop.f32.mrf.mxu1 }
 0x24c   : > { %2164 = vmatmul.mubr.f32.vlgmr.msra.gmra.mxu0 %v1459_v50  ;;  %v1453_v7 = vadd.f32 %v2076_v2, %v1405_v5 }
 0x24d   : > { %2202 = vmatpush3.msra.mxu0 %v1648_v51  ;;  %v2078_v55 = vpop.f32.mrf.mxu1  ;;  %2233 = vmatprep.mubr.msk.f32.mxu0 %vm2623_vm1, %v2622_v29 }
 0x24e   : > { %2203 = vmatprep.subr.mxu0 %v2622_v29  ;;  %v1460_v10 = vmax.f32 %v1453_v7, 0.0 }
 0x24f   : > { %2204 = vmatpush3.msra.mxu0 %v1647_v54 }
 0x250   : > { %2205 = vmatprep.subr.mxu0 %v2622_v29 }
 0x251   : > { %2206 = vmatpush3.msra.mxu0 %v1646_v56 }
 0x252   : > { %2207 = vmatprep.subr.mxu0 %v2622_v29 }
 0x253   : > { %2208 = vmatpush3.msra.mxu0 %v1645_v57 }
 0x254   : > { %2209 = vmatprep.subr.mxu0 %v2622_v29 }
 0x255   : > { %2210 = vmatpush3.msra.mxu0 %v1644_v21 }
 0x256   : > { %2211 = vmatprep.subr.mxu0 %v2622_v29 }
 0x257   : > { %2212 = vmatpush3.msra.mxu0 %v1643_v31 }
 0x258   : > { %2213 = vmatprep.subr.mxu0 %v2622_v29 }
 0x259   : > { %2214 = vmatpush3.msra.mxu0 %v1642_v58 }
 0x25a   : > { %2215 = vmatprep.subr.mxu0 %v2622_v29 }
 0x25b   : > { %2216 = vmatpush3.msra.mxu0 %v1641_v59 }
 0x25c   : > { %2217 = vmatprep.subr.mxu0 %v2622_v29 }
 0x25d   : > { %2218 = vmatpush3.msra.mxu0 %v1640_v60 }
 0x25e   : > { %2219 = vmatprep.subr.mxu0 %v2622_v29 }
 0x25f   : > { %2220 = vmatpush3.msra.mxu0 %v1639_v61 }
 0x260   : > { %2221 = vmatprep.subr.mxu0 %v2622_v29 }
 0x261   : > { %2222 = vmatpush3.msra.mxu0 %v1638_v53 }
 0x262   : > { %2223 = vmatprep.subr.mxu0 %v2622_v29 }
 0x263   : > { %2224 = vmatpush3.msra.mxu0 %v1637_v0 }
 0x264   : > { %2225 = vmatprep.subr.mxu0 %v2622_v29 }
 0x265   : > { %2226 = vmatpush3.msra.mxu0 %v1636_v4 }
 0x266   : > { %2227 = vmatprep.subr.mxu0 %v2622_v29 }
 0x267   : > { %2228 = vmatpush3.msra.mxu0 %v1635_v6 }
 0x268   : > { %2229 = vmatprep.subr.mxu0 %v2622_v29 }
 0x269   : > { %2230 = vmatpush3.msra.mxu0 %v1634_v3 }
 0x26a   : > { %2231 = vmatprep.subr.mxu0 %v2622_v29 }
 0x26b   : > { %2232 = vmatpush3.msra.mxu0 %v1633_v8 }
 0x26c   : > { %2234 = vmatmul.mubr.f32.vlgmr.msra.gmra.mxu0 %v1460_v10 }
 0x308   : > { %v1629_v11 = vpop.f32.mrf.mxu1 }
 0x30a   : > { %v2200_v46 = vpop.f32.mrf.mxu1 }
 0x30c   : > { %v1559_v13 = vpop.f32.mrf.mxu0 }
 0x30d   : > { %v1630_v15 = vadd.f32 %v1629_v11, %v1559_v13 }
 0x30e   : > { %v2165_v14 = vpop.f32.mrf.mxu0 }
 0x32c   : > { %v1715_v16 = vpop.f32.mrf.mxu0 }
 0x32d   : > { %v1719_v17 = vadd.f32 %v1715_v16, %v1630_v15 }
 0x32e   : > { %v2235_v18 = vpop.f32.mrf.mxu0 }
 0x32f   : > { %v1727_v19 = vadd.f32 %v1963_v9, %v1719_v17 }
 0x331   : > { %1728 = vmax.xlane.f32.xlu0 %v1727_v19 }
 0x3ba   : > { %v1729_v20 = vpop.xlane.xlu0 %1728 }
 0x3bb   : > { %v1730_v29 = vsub.f32 %v1727_v19, %v1729_v20 }
 0x3bd   : > { %v1731_v22 = vmul.f32 1.442695, %v1730_v29 }
 0x3bf   : > { %2399 = vpow2.f32 %v1731_v22 }
 0x3cc   : > { %v2400_v23 = vpop.eup %2399 }
 0x3cd   : > { %1733 = vadd.xlane.f32.xlu0 %v2400_v23 }
 0x456   : > { %v1734_v24 = vpop.xlane.xlu0 %1733 }
 0x457   : > { %2401 = vrcp.f32 %v1734_v24 }
 0x464   : > { %v2402_v12 = vpop.eup %2401 }
 0x465   : > { %v1736_v26 = vmul.f32 %v2402_v12, %v2400_v23 }
 0x467   : > { %1737 = vst [vmem:[%s351_s22] sm:$0xff] %v1736_v26 }
 0x468   : > { %2548 = shalt.err (!%p2545_p5)
}
 0x469   : > { %s2549_s9 = scalar_lea.hbm %s1750_s17, 128  ;;  %s2553_s21 = scalar_lea.hbm %s3016_s7, 256 }
 0x46a   : > { %p2550_p0 = scmp.ne.s32.totalorder %s1750_s17, %s2549_s9  ;;  %p2554_p10 = scmp.lt.s32.totalorder %s1750_s17, %s3016_s7 }
 0x46b   : > { %p2555_p1 = scmp.lt.s32.totalorder %s2553_s21, %s2549_s9 }
 0x46c   : > { %p2551_p7 = pnand %p2550_p0, %p3040_p8 }
 0x46d   : > { %p2556_p2 = por %p2555_p1, %p2554_p10 }
 0x46e   : > { %p2552_p11 = pneg %p2551_p7 }
 0x470   : > { %p2557_p4 = pnand %p2556_p2, %p2552_p11 }
 0x472   : > { %2560 = shalt.err (!%p2557_p4)
}
 0x473   : > { %2256 = dma.vmem_to_hbm [thread:$0]  (%p3040_p8), %s1753_s20, 128, %s1750_s17, %s1739_s18  }
 0x474 PF: > { %s1764_s22 = sand.u32 1, %s2595_s24   ;;  %p3041_p12 = scmp.ne.s32.totalorder %s3025_s8, 0 }
 0x475   : > { %p3042_p6 = scmp.ge.s32.totalorder %s2607_s27, 2  ;;  %s1765_s1 = scalar_lea.sflag [#allocation4], %s1764_s22 }
 0x477   : > { %p2276_p3 = pnand %p3042_p6, %p3041_p12 }
 0x479   : > { %p2277_p9 = pneg %p2276_p3 }
 0x47b   : > { %2590 = dma.done.wait (%p2277_p9), %s1765_s1, 128  }
 0x47c   : > { %2592 = vsyncadd (%p2277_p9), %s1765_s1, 4294967168  ;;  %p22_p13 = scmp.ge.s32.totalorder %s2756_s23, 4   ;;  %s3043_s24 = smov %s2599_s25 }
 0x47d   : > { %s3044_s25 = smov %s2603_s26  ;;  %s3045_s26 = smov %s2765_s11 }
 0x47e   : > { %s3046_s27 = smov %s2756_s23  ;;  %24 = sbr.rel (!%p22_p13) target bundleno = 9 (0x9), region = 109 }
 0x483   :  { %1770 = vsyncpa [#allocation3], 1 }
 0x484   :  { %1772 = vsyncpa [#allocation3 + $0x1], 1 }
 0x485   :  { %1773 = vsyncpa [#allocation6], 1 }
 0x486   :  { %1774 = vsyncpa [#allocation9], 1 }
 0x487   :  { %1775 = vsyncpa [#allocation4], 1 }
 0x488   :  { %1777 = vsyncpa [#allocation4 + $0x1], 1 }

</bundles_post_ra>
